<compile_context>
chip_gen: v6e
topology: v6e:2x2x1
jax: 0.10.0
libtpu: 0.0.40
codegen_flags: <defaults>
</compile_context>

<pallas_src>
import numpy as np
import jax
import jax.numpy as jnp
from jax.experimental import pallas as pl
from jax.experimental.pallas import tpu as pltpu

_BN_EPS = 1e-5                     # BatchNormLocal eps
_LRELU_SLOPE = 0.2                 # nn.LeakyReLU(0.2)
_INV_SQRT2 = float(1.0 / np.sqrt(2.0))


def _disc_heads_kernel(feat_ref,
                       w1_ref, b1_ref, g1_ref, be1_ref,
                       w2_ref, b2_ref, g2_ref, be2_ref,
                       wc_ref, bc_ref,
                       out_ref):
    """One grid step == one DiscHead:
       make_block(k=1) -> ResidualBlock(make_block(k=9, circular)) -> cls conv."""
    _, B, N, C = feat_ref.shape
    K = w2_ref.shape[1] // C       # 9
    P = (K - 1) // 2               # 4 (circular padding)

    def bn_lrelu(h, gamma, beta):
        # BatchNormLocal(virtual_bs=8): for B <= virtual_bs there is a single
        # group, so stats reduce over (batch, tokens) per channel (unbiased=False).
        mean = jnp.mean(h, axis=(0, 1), keepdims=True)
        var = jnp.mean((h - mean) ** 2, axis=(0, 1), keepdims=True)
        h = (h - mean) * jax.lax.rsqrt(var + _BN_EPS)
        h = h * gamma + beta                                  # (1, C) broadcasts
        return jnp.where(h > 0.0, h, _LRELU_SLOPE * h)        # LeakyReLU(0.2)

    x = feat_ref[0]                                           # (B, N, C) bf16

    # ---- block 1: SpectralConv1d(k=1) on MXU (bf16 in, f32 acc) + BN + LeakyReLU
    h1 = jnp.dot(x.reshape(B * N, C), w1_ref[0],
                 preferred_element_type=jnp.float32).reshape(B, N, C)
    h1 = bn_lrelu(h1 + b1_ref[0], g1_ref[0], be1_ref[0])

    # ---- block 2: ResidualBlock(SpectralConv1d(k=9, circular) + BN + LeakyReLU)
    # circular conv == one deep matmul over K rolled copies of h1 (roll on the
    # token/sublane axis goes to the XLU; accumulation happens on the MXU in f32).
    taps = []
    for k in range(K):                                        # static unroll
        s = (P - k) % N
        taps.append(h1 if s == 0 else pltpu.roll(h1, s, axis=1))
    xc = jnp.concatenate(taps, axis=-1).astype(jnp.bfloat16)  # (B, N, K*C)
    h2 = jnp.dot(xc.reshape(B * N, K * C), w2_ref[0],
                 preferred_element_type=jnp.float32).reshape(B, N, C)
    h2 = bn_lrelu(h2 + b2_ref[0], g2_ref[0], be2_ref[0])
    h = (h2 + h1) * jnp.float32(_INV_SQRT2)                   # residual / sqrt(2)

    # ---- cls: SpectralConv1d(C -> 1, k=1) as VPU scale + lane reduction
    # (avoids a 1-column MXU matmul); scalar bias read from SMEM.
    logits = jnp.sum(h * wc_ref[0], axis=-1) + bc_ref[pl.program_id(0)]
    out_ref[0] = logits.astype(out_ref.dtype)                 # (B, N)


def sana_mscm_discriminator_forward(feats, head_params):
    """feats: list of hooked block outputs (B, N, hidden), one per DiscHead.
    Returns the torch.cat(res_list, dim=1) equivalent of shape (B, H*N)."""
    H = len(feats)
    B, N, C = feats[0].shape
    feat = jnp.stack(feats, axis=0).astype(jnp.bfloat16)      # (H, B, N, C)

    def stk(name):
        return jnp.stack([p[name] for p in head_params], axis=0)

    w1, b1, g1, be1 = stk("w1"), stk("b1"), stk("g1"), stk("be1")
    w2, b2, g2, be2 = stk("w2"), stk("b2"), stk("g2"), stk("be2")
    wc, bc = stk("wc"), stk("bc")
    K = w2.shape[1] // C

    def head_spec(*block_shape):
        # one head per grid step; per-head blocks equal the full trailing dims,
        # so the (8,128) tiling constraint is always satisfied.
        return pl.BlockSpec(block_shape,
                            lambda h: (h,) + (0,) * (len(block_shape) - 1))

    grid_spec = pltpu.PrefetchScalarGridSpec(
        num_scalar_prefetch=0,
        grid=(H,),
        in_specs=[
            head_spec(1, B, N, C),                            # feat     (bf16)
            head_spec(1, C, C),                               # w1       (bf16)
            head_spec(1, 1, C),                               # b1
            head_spec(1, 1, C),                               # g1
            head_spec(1, 1, C),                               # be1
            head_spec(1, K * C, C),                           # w2 deep  (bf16)
            head_spec(1, 1, C),                               # b2
            head_spec(1, 1, C),                               # g2
            head_spec(1, 1, C),                               # be2
            head_spec(1, 1, C),                               # wc
            pl.BlockSpec(memory_space=pltpu.MemorySpace.SMEM),  # bc (H,) scalars
        ],
        out_specs=pl.BlockSpec((1, B, N), lambda h: (h, 0, 0)),
    )

    out = pl.pallas_call(
        _disc_heads_kernel,
        out_shape=jax.ShapeDtypeStruct((H, B, N), jnp.float32),
        grid_spec=grid_spec,
        compiler_params=pltpu.CompilerParams(
            dimension_semantics=("parallel",),                # heads are independent
            vmem_limit_bytes=48 * 1024 * 1024),               # safe on v5e/v6e/v7x
    )(feat, w1, b1, g1, be1, w2, b2, g2, be2, wc, bc)

    # torch.cat(res_list, dim=1): head h occupies columns [h*N, (h+1)*N).
    return jnp.transpose(out, (1, 0, 2)).reshape(B, H * N)


# ---------------- parameter setup (glue, deterministic) ----------------
def make_head_params(key, C, K=9):
    ks = jax.random.split(key, 7)

    def conv_init(k, out_c, in_c, ksz):
        # torch Conv1d default init + spectral_norm; exact sigma at init
        # (torch uses a power-iteration estimate updated at forward time).
        bound = 1.0 / np.sqrt(in_c * ksz)
        w = jax.random.uniform(k, (out_c, in_c, ksz), jnp.float32, -bound, bound)
        b = jax.random.uniform(jax.random.fold_in(k, 1), (out_c,), jnp.float32,
                               -bound, bound)
        sigma = np.linalg.norm(np.asarray(w).reshape(out_c, -1), 2)
        return w / jnp.float32(sigma), b

    w1, b1 = conv_init(ks[0], C, C, 1)
    w2, b2 = conv_init(ks[1], C, C, K)
    wc, bc = conv_init(ks[2], 1, C, 1)
    # deep-stacked circular-conv weight: rows [k*C:(k+1)*C, :] = w2[:, :, k].T
    w2_deep = jnp.transpose(w2, (2, 1, 0)).reshape(K * C, C)
    # BatchNormLocal affine params (torch init is ones/zeros; mildly randomized
    # here so the affine path is genuinely exercised by the correctness check).
    return dict(
        w1=jnp.transpose(w1[:, :, 0]).astype(jnp.bfloat16),   # (C_in, C_out) bf16
        b1=b1.reshape(1, C),
        g1=1.0 + 0.1 * jax.random.normal(ks[3], (1, C), jnp.float32),
        be1=0.1 * jax.random.normal(ks[4], (1, C), jnp.float32),
        w2=w2_deep.astype(jnp.bfloat16),                      # (K*C_in, C_out) bf16
        b2=b2.reshape(1, C),
        g2=1.0 + 0.1 * jax.random.normal(ks[5], (1, C), jnp.float32),
        be2=0.1 * jax.random.normal(ks[6], (1, C), jnp.float32),
        wc=wc[:, :, 0].reshape(1, C),                         # (1, C_in) f32 row
        bc=bc.reshape(()),                                    # scalar (goes to SMEM)
    )


# ---------------- pure-JAX reference (for correctness check) ----------------
def _ref_head(feat, p):
    B, N, C = feat.shape
    x = feat.astype(jnp.bfloat16).astype(jnp.float32)         # same quantization
    w1 = p["w1"].astype(jnp.float32)
    w2 = p["w2"].astype(jnp.float32)                          # (K*C, C)
    K = w2.shape[0] // C
    P = (K - 1) // 2
    hi = jax.lax.Precision.HIGHEST

    def bn_lrelu(h, g, b):
        m = h.mean(axis=(0, 1), keepdims=True)
        v = ((h - m) ** 2).mean(axis=(0, 1), keepdims=True)
        h = (h - m) * jax.lax.rsqrt(v + _BN_EPS) * g + b
        return jnp.where(h > 0, h, _LRELU_SLOPE * h)

    h1 = bn_lrelu(jnp.einsum("bnc,co->bno", x, w1, precision=hi) + p["b1"],
                  p["g1"], p["be1"])
    h1b = h1.astype(jnp.bfloat16).astype(jnp.float32)
    acc = jnp.zeros((B, N, C), jnp.float32)
    for k in range(K):
        wk = w2[k * C:(k + 1) * C, :]
        acc = acc + jnp.einsum("bnc,co->bno",
                               jnp.roll(h1b, (P - k) % N, axis=1), wk, precision=hi)
    h2 = bn_lrelu(acc + p["b2"], p["g2"], p["be2"])
    h = (h2 + h1) * jnp.float32(_INV_SQRT2)
    return jnp.sum(h * p["wc"], axis=-1) + p["bc"]


if __name__ == "__main__":
    # Default module (is_multiscale=False) has a single head; demo 2 heads
    # (head_block_ids-style) to exercise the fused "parallel" head grid axis.
    B, N, C, K, H = 2, 8, 32, 9, 2
    key = jax.random.PRNGKey(0)
    kfeat, kpar = jax.random.split(key)
    feat_keys = jax.random.split(kfeat, H)
    par_keys = jax.random.split(kpar, H)

    feats = [jax.random.normal(feat_keys[i], (B, N, C), jnp.float32)
             for i in range(H)]                               # hooked block outputs
    head_params = [make_head_params(par_keys[i], C, K) for i in range(H)]

    out = sana_mscm_discriminator_forward(feats, head_params)
    out = jax.block_until_ready(out)
    assert out.shape == (B, H * N), out.shape

    ref = jnp.concatenate([_ref_head(f, p) for f, p in zip(feats, head_params)],
                          axis=1)
    np.testing.assert_allclose(np.asarray(out), np.asarray(ref),
                               rtol=5e-3, atol=5e-3)
    print("KERNEL_OK")
</pallas_src>

<mosaic_0001>
module attributes {stable_mosaic.version = 11 : i64} {
  func.func @_disc_heads_kernel(%arg0: i32, %arg1: memref<1x2x8x32xbf16, #tpu.memory_space<vmem>>, %arg2: memref<1x32x32xbf16, #tpu.memory_space<vmem>>, %arg3: memref<1x1x32xf32, #tpu.memory_space<vmem>>, %arg4: memref<1x1x32xf32, #tpu.memory_space<vmem>>, %arg5: memref<1x1x32xf32, #tpu.memory_space<vmem>>, %arg6: memref<1x288x32xbf16, #tpu.memory_space<vmem>>, %arg7: memref<1x1x32xf32, #tpu.memory_space<vmem>>, %arg8: memref<1x1x32xf32, #tpu.memory_space<vmem>>, %arg9: memref<1x1x32xf32, #tpu.memory_space<vmem>>, %arg10: memref<1x1x32xf32, #tpu.memory_space<vmem>>, %arg11: memref<2xf32, #tpu.memory_space<smem>>, %arg12: memref<1x2x8xf32, #tpu.memory_space<vmem>>) attributes {dimension_semantics = [#tpu.dimension_semantics<parallel>], iteration_bounds = array<i64: 2>, scalar_prefetch = 0 : i64, scratch_operands = 0 : i64, tpu.core_type = #tpu.core_type<tc>, window_params = [{transform_indices = @transform_0, window_bounds = array<i64: 1, 2, 8, 32>}, {transform_indices = @transform_1, window_bounds = array<i64: 1, 32, 32>}, {transform_indices = @transform_2, window_bounds = array<i64: 1, 1, 32>}, {transform_indices = @transform_3, window_bounds = array<i64: 1, 1, 32>}, {transform_indices = @transform_4, window_bounds = array<i64: 1, 1, 32>}, {transform_indices = @transform_5, window_bounds = array<i64: 1, 288, 32>}, {transform_indices = @transform_6, window_bounds = array<i64: 1, 1, 32>}, {transform_indices = @transform_7, window_bounds = array<i64: 1, 1, 32>}, {transform_indices = @transform_8, window_bounds = array<i64: 1, 1, 32>}, {transform_indices = @transform_9, window_bounds = array<i64: 1, 1, 32>}, {transform_indices = @transform_10, window_bounds = array<i64: 2>}, {transform_indices = @transform_11, window_bounds = array<i64: 1, 2, 8>}]} {
    %c0 = arith.constant 0 : index
    %c0_0 = arith.constant 0 : index
    %c0_1 = arith.constant 0 : index
    %c0_2 = arith.constant 0 : index
    %0 = vector.load %arg1[%c0, %c0_0, %c0_1, %c0_2] : memref<1x2x8x32xbf16, #tpu.memory_space<vmem>>, vector<1x2x8x32xbf16>
    %1 = vector.shape_cast %0 : vector<1x2x8x32xbf16> to vector<2x8x32xbf16>
    %2 = vector.shape_cast %1 : vector<2x8x32xbf16> to vector<16x32xbf16>
    %c0_3 = arith.constant 0 : index
    %c0_4 = arith.constant 0 : index
    %c0_5 = arith.constant 0 : index
    %3 = vector.load %arg2[%c0_3, %c0_4, %c0_5] : memref<1x32x32xbf16, #tpu.memory_space<vmem>>, vector<1x32x32xbf16>
    %4 = vector.shape_cast %3 : vector<1x32x32xbf16> to vector<32x32xbf16>
    %cst = arith.constant dense<0.000000e+00> : vector<16x32xf32>
    %5 = tpu.matmul %2, %4, %cst {dimension_numbers = #tpu.dot_dimension_numbers<[1], [0], [0], [1], [0, 0, 1, 1], [], []>} : vector<16x32xbf16>, vector<32x32xbf16>, vector<16x32xf32> -> vector<16x32xf32>
    %6 = vector.shape_cast %5 : vector<16x32xf32> to vector<2x8x32xf32>
    %c0_6 = arith.constant 0 : index
    %c0_7 = arith.constant 0 : index
    %c0_8 = arith.constant 0 : index
    %7 = vector.load %arg3[%c0_6, %c0_7, %c0_8] : memref<1x1x32xf32, #tpu.memory_space<vmem>>, vector<1x1x32xf32>
    %8 = vector.shape_cast %7 : vector<1x1x32xf32> to vector<1x32xf32>
    %9 = vector.shape_cast %8 : vector<1x32xf32> to vector<1x1x32xf32>
    %10 = vector.broadcast %9 : vector<1x1x32xf32> to vector<2x8x32xf32>
    %11 = arith.addf %6, %10 : vector<2x8x32xf32>
    %c0_9 = arith.constant 0 : index
    %c0_10 = arith.constant 0 : index
    %c0_11 = arith.constant 0 : index
    %12 = vector.load %arg4[%c0_9, %c0_10, %c0_11] : memref<1x1x32xf32, #tpu.memory_space<vmem>>, vector<1x1x32xf32>
    %13 = vector.shape_cast %12 : vector<1x1x32xf32> to vector<1x32xf32>
    %c0_12 = arith.constant 0 : index
    %c0_13 = arith.constant 0 : index
    %c0_14 = arith.constant 0 : index
    %14 = vector.load %arg5[%c0_12, %c0_13, %c0_14] : memref<1x1x32xf32, #tpu.memory_space<vmem>>, vector<1x1x32xf32>
    %15 = vector.shape_cast %14 : vector<1x1x32xf32> to vector<1x32xf32>
    %cst_15 = arith.constant dense<0.000000e+00> : vector<32xf32>
    %16 = vector.multi_reduction <add>, %11, %cst_15 [0, 1] : vector<2x8x32xf32> to vector<32xf32>
    %17 = vector.shape_cast %16 : vector<32xf32> to vector<1x1x32xf32>
    %cst_16 = arith.constant 1.600000e+01 : f32
    %18 = vector.broadcast %cst_16 : f32 to vector<1x1x32xf32>
    %19 = arith.divf %17, %18 : vector<1x1x32xf32>
    %20 = vector.broadcast %19 : vector<1x1x32xf32> to vector<2x8x32xf32>
    %21 = arith.subf %11, %20 : vector<2x8x32xf32>
    %22 = arith.mulf %21, %21 : vector<2x8x32xf32>
    %cst_17 = arith.constant dense<0.000000e+00> : vector<32xf32>
    %23 = vector.multi_reduction <add>, %22, %cst_17 [0, 1] : vector<2x8x32xf32> to vector<32xf32>
    %24 = vector.shape_cast %23 : vector<32xf32> to vector<1x1x32xf32>
    %cst_18 = arith.constant 1.600000e+01 : f32
    %25 = vector.broadcast %cst_18 : f32 to vector<1x1x32xf32>
    %26 = arith.divf %24, %25 : vector<1x1x32xf32>
    %27 = vector.broadcast %19 : vector<1x1x32xf32> to vector<2x8x32xf32>
    %28 = arith.subf %11, %27 : vector<2x8x32xf32>
    %cst_19 = arith.constant 9.99999974E-6 : f32
    %29 = vector.broadcast %cst_19 : f32 to vector<1x1x32xf32>
    %30 = arith.addf %26, %29 : vector<1x1x32xf32>
    %31 = math.rsqrt %30 : vector<1x1x32xf32>
    %32 = vector.broadcast %31 : vector<1x1x32xf32> to vector<2x8x32xf32>
    %33 = arith.mulf %28, %32 : vector<2x8x32xf32>
    %34 = vector.shape_cast %13 : vector<1x32xf32> to vector<1x1x32xf32>
    %35 = vector.broadcast %34 : vector<1x1x32xf32> to vector<2x8x32xf32>
    %36 = arith.mulf %33, %35 : vector<2x8x32xf32>
    %37 = vector.shape_cast %15 : vector<1x32xf32> to vector<1x1x32xf32>
    %38 = vector.broadcast %37 : vector<1x1x32xf32> to vector<2x8x32xf32>
    %39 = arith.addf %36, %38 : vector<2x8x32xf32>
    %cst_20 = arith.constant 0.000000e+00 : f32
    %40 = vector.broadcast %cst_20 : f32 to vector<2x8x32xf32>
    %41 = arith.cmpf ogt, %39, %40 : vector<2x8x32xf32>
    %cst_21 = arith.constant 2.000000e-01 : f32
    %42 = vector.broadcast %cst_21 : f32 to vector<2x8x32xf32>
    %43 = arith.mulf %42, %39 : vector<2x8x32xf32>
    %44 = arith.select %41, %39, %43 : vector<2x8x32xi1>, vector<2x8x32xf32>
    %c4_i32 = arith.constant 4 : i32
    %45 = tpu.dynamic_rotate %44 by %c4_i32 dim 1 : vector<2x8x32xf32>, i32 -> vector<2x8x32xf32>
    %c3_i32 = arith.constant 3 : i32
    %46 = tpu.dynamic_rotate %44 by %c3_i32 dim 1 : vector<2x8x32xf32>, i32 -> vector<2x8x32xf32>
    %c2_i32 = arith.constant 2 : i32
    %47 = tpu.dynamic_rotate %44 by %c2_i32 dim 1 : vector<2x8x32xf32>, i32 -> vector<2x8x32xf32>
    %c1_i32 = arith.constant 1 : i32
    %48 = tpu.dynamic_rotate %44 by %c1_i32 dim 1 : vector<2x8x32xf32>, i32 -> vector<2x8x32xf32>
    %c7_i32 = arith.constant 7 : i32
    %49 = tpu.dynamic_rotate %44 by %c7_i32 dim 1 : vector<2x8x32xf32>, i32 -> vector<2x8x32xf32>
    %c6_i32 = arith.constant 6 : i32
    %50 = tpu.dynamic_rotate %44 by %c6_i32 dim 1 : vector<2x8x32xf32>, i32 -> vector<2x8x32xf32>
    %c5_i32 = arith.constant 5 : i32
    %51 = tpu.dynamic_rotate %44 by %c5_i32 dim 1 : vector<2x8x32xf32>, i32 -> vector<2x8x32xf32>
    %c4_i32_22 = arith.constant 4 : i32
    %52 = tpu.dynamic_rotate %44 by %c4_i32_22 dim 1 : vector<2x8x32xf32>, i32 -> vector<2x8x32xf32>
    %53 = tpu.concatenate %45, %46, %47, %48, %44, %49, %50, %51, %52 in 2 : vector<2x8x32xf32>, vector<2x8x32xf32>, vector<2x8x32xf32>, vector<2x8x32xf32>, vector<2x8x32xf32>, vector<2x8x32xf32>, vector<2x8x32xf32>, vector<2x8x32xf32>, vector<2x8x32xf32> -> vector<2x8x288xf32>
    %54 = arith.truncf %53 : vector<2x8x288xf32> to vector<2x8x288xbf16>
    %55 = vector.shape_cast %54 : vector<2x8x288xbf16> to vector<16x288xbf16>
    %c0_23 = arith.constant 0 : index
    %c0_24 = arith.constant 0 : index
    %c0_25 = arith.constant 0 : index
    %56 = vector.load %arg6[%c0_23, %c0_24, %c0_25] : memref<1x288x32xbf16, #tpu.memory_space<vmem>>, vector<1x288x32xbf16>
    %57 = vector.shape_cast %56 : vector<1x288x32xbf16> to vector<288x32xbf16>
    %cst_26 = arith.constant dense<0.000000e+00> : vector<16x32xf32>
    %58 = tpu.matmul %55, %57, %cst_26 {dimension_numbers = #tpu.dot_dimension_numbers<[1], [0], [0], [1], [0, 0, 1, 1], [], []>} : vector<16x288xbf16>, vector<288x32xbf16>, vector<16x32xf32> -> vector<16x32xf32>
    %59 = vector.shape_cast %58 : vector<16x32xf32> to vector<2x8x32xf32>
    %c0_27 = arith.constant 0 : index
    %c0_28 = arith.constant 0 : index
    %c0_29 = arith.constant 0 : index
    %60 = vector.load %arg7[%c0_27, %c0_28, %c0_29] : memref<1x1x32xf32, #tpu.memory_space<vmem>>, vector<1x1x32xf32>
    %61 = vector.shape_cast %60 : vector<1x1x32xf32> to vector<1x32xf32>
    %62 = vector.shape_cast %61 : vector<1x32xf32> to vector<1x1x32xf32>
    %63 = vector.broadcast %62 : vector<1x1x32xf32> to vector<2x8x32xf32>
    %64 = arith.addf %59, %63 : vector<2x8x32xf32>
    %c0_30 = arith.constant 0 : index
    %c0_31 = arith.constant 0 : index
    %c0_32 = arith.constant 0 : index
    %65 = vector.load %arg8[%c0_30, %c0_31, %c0_32] : memref<1x1x32xf32, #tpu.memory_space<vmem>>, vector<1x1x32xf32>
    %66 = vector.shape_cast %65 : vector<1x1x32xf32> to vector<1x32xf32>
    %c0_33 = arith.constant 0 : index
    %c0_34 = arith.constant 0 : index
    %c0_35 = arith.constant 0 : index
    %67 = vector.load %arg9[%c0_33, %c0_34, %c0_35] : memref<1x1x32xf32, #tpu.memory_space<vmem>>, vector<1x1x32xf32>
    %68 = vector.shape_cast %67 : vector<1x1x32xf32> to vector<1x32xf32>
    %cst_36 = arith.constant dense<0.000000e+00> : vector<32xf32>
    %69 = vector.multi_reduction <add>, %64, %cst_36 [0, 1] : vector<2x8x32xf32> to vector<32xf32>
    %70 = vector.shape_cast %69 : vector<32xf32> to vector<1x1x32xf32>
    %cst_37 = arith.constant 1.600000e+01 : f32
    %71 = vector.broadcast %cst_37 : f32 to vector<1x1x32xf32>
    %72 = arith.divf %70, %71 : vector<1x1x32xf32>
    %73 = vector.broadcast %72 : vector<1x1x32xf32> to vector<2x8x32xf32>
    %74 = arith.subf %64, %73 : vector<2x8x32xf32>
    %75 = arith.mulf %74, %74 : vector<2x8x32xf32>
    %cst_38 = arith.constant dense<0.000000e+00> : vector<32xf32>
    %76 = vector.multi_reduction <add>, %75, %cst_38 [0, 1] : vector<2x8x32xf32> to vector<32xf32>
    %77 = vector.shape_cast %76 : vector<32xf32> to vector<1x1x32xf32>
    %cst_39 = arith.constant 1.600000e+01 : f32
    %78 = vector.broadcast %cst_39 : f32 to vector<1x1x32xf32>
    %79 = arith.divf %77, %78 : vector<1x1x32xf32>
    %80 = vector.broadcast %72 : vector<1x1x32xf32> to vector<2x8x32xf32>
    %81 = arith.subf %64, %80 : vector<2x8x32xf32>
    %cst_40 = arith.constant 9.99999974E-6 : f32
    %82 = vector.broadcast %cst_40 : f32 to vector<1x1x32xf32>
    %83 = arith.addf %79, %82 : vector<1x1x32xf32>
    %84 = math.rsqrt %83 : vector<1x1x32xf32>
    %85 = vector.broadcast %84 : vector<1x1x32xf32> to vector<2x8x32xf32>
    %86 = arith.mulf %81, %85 : vector<2x8x32xf32>
    %87 = vector.shape_cast %66 : vector<1x32xf32> to vector<1x1x32xf32>
    %88 = vector.broadcast %87 : vector<1x1x32xf32> to vector<2x8x32xf32>
    %89 = arith.mulf %86, %88 : vector<2x8x32xf32>
    %90 = vector.shape_cast %68 : vector<1x32xf32> to vector<1x1x32xf32>
    %91 = vector.broadcast %90 : vector<1x1x32xf32> to vector<2x8x32xf32>
    %92 = arith.addf %89, %91 : vector<2x8x32xf32>
    %cst_41 = arith.constant 0.000000e+00 : f32
    %93 = vector.broadcast %cst_41 : f32 to vector<2x8x32xf32>
    %94 = arith.cmpf ogt, %92, %93 : vector<2x8x32xf32>
    %cst_42 = arith.constant 2.000000e-01 : f32
    %95 = vector.broadcast %cst_42 : f32 to vector<2x8x32xf32>
    %96 = arith.mulf %95, %92 : vector<2x8x32xf32>
    %97 = arith.select %94, %92, %96 : vector<2x8x32xi1>, vector<2x8x32xf32>
    %98 = arith.addf %97, %44 : vector<2x8x32xf32>
    %cst_43 = arith.constant 0.707106769 : f32
    %99 = vector.broadcast %cst_43 : f32 to vector<2x8x32xf32>
    %100 = arith.mulf %98, %99 : vector<2x8x32xf32>
    %c0_44 = arith.constant 0 : index
    %c0_45 = arith.constant 0 : index
    %c0_46 = arith.constant 0 : index
    %101 = vector.load %arg10[%c0_44, %c0_45, %c0_46] : memref<1x1x32xf32, #tpu.memory_space<vmem>>, vector<1x1x32xf32>
    %102 = vector.shape_cast %101 : vector<1x1x32xf32> to vector<1x32xf32>
    %103 = vector.shape_cast %102 : vector<1x32xf32> to vector<1x1x32xf32>
    %104 = vector.broadcast %103 : vector<1x1x32xf32> to vector<2x8x32xf32>
    %105 = arith.mulf %100, %104 : vector<2x8x32xf32>
    %cst_47 = arith.constant dense<0.000000e+00> : vector<2x8xf32>
    %106 = vector.multi_reduction <add>, %105, %cst_47 [2] : vector<2x8x32xf32> to vector<2x8xf32>
    %107 = arith.index_cast %arg0 : i32 to index
    %108 = memref.load %arg11[%107] : memref<2xf32, #tpu.memory_space<smem>>
    %109 = vector.broadcast %108 : f32 to vector<2x8xf32>
    %110 = arith.addf %106, %109 : vector<2x8xf32>
    %c0_48 = arith.constant 0 : index
    %c0_49 = arith.constant 0 : index
    %c0_50 = arith.constant 0 : index
    %111 = vector.load %arg12[%c0_48, %c0_49, %c0_50] : memref<1x2x8xf32, #tpu.memory_space<vmem>>, vector<1x2x8xf32>
    %112 = vector.shape_cast %111 : vector<1x2x8xf32> to vector<2x8xf32>
    %113 = vector.shape_cast %110 : vector<2x8xf32> to vector<1x2x8xf32>
    tpu.vector_store %arg12[%c0_48, %c0_49, %c0_50], %113 {strides = array<i32>} : memref<1x2x8xf32, #tpu.memory_space<vmem>>, vector<1x2x8xf32>,
    return
  }
  func.func @transform_0(%arg0: i32) -> (i32, i32, i32, i32) {
    %c0_i32 = arith.constant 0 : i32
    %c0_i32_0 = arith.constant 0 : i32
    %c0_i32_1 = arith.constant 0 : i32
    %c0_i32_2 = arith.constant 0 : i32
    return %arg0, %c0_i32, %c0_i32_0, %c0_i32_1 : i32, i32, i32, i32
  }
  func.func @transform_1(%arg0: i32) -> (i32, i32, i32) {
    %c0_i32 = arith.constant 0 : i32
    %c0_i32_0 = arith.constant 0 : i32
    %c0_i32_1 = arith.constant 0 : i32
    return %arg0, %c0_i32, %c0_i32_0 : i32, i32, i32
  }
  func.func @transform_2(%arg0: i32) -> (i32, i32, i32) {
    %c0_i32 = arith.constant 0 : i32
    %c0_i32_0 = arith.constant 0 : i32
    %c0_i32_1 = arith.constant 0 : i32
    return %arg0, %c0_i32, %c0_i32_0 : i32, i32, i32
  }
  func.func @transform_3(%arg0: i32) -> (i32, i32, i32) {
    %c0_i32 = arith.constant 0 : i32
    %c0_i32_0 = arith.constant 0 : i32
    %c0_i32_1 = arith.constant 0 : i32
    return %arg0, %c0_i32, %c0_i32_0 : i32, i32, i32
  }
  func.func @transform_4(%arg0: i32) -> (i32, i32, i32) {
    %c0_i32 = arith.constant 0 : i32
    %c0_i32_0 = arith.constant 0 : i32
    %c0_i32_1 = arith.constant 0 : i32
    return %arg0, %c0_i32, %c0_i32_0 : i32, i32, i32
  }
  func.func @transform_5(%arg0: i32) -> (i32, i32, i32) {
    %c0_i32 = arith.constant 0 : i32
    %c0_i32_0 = arith.constant 0 : i32
    %c0_i32_1 = arith.constant 0 : i32
    return %arg0, %c0_i32, %c0_i32_0 : i32, i32, i32
  }
  func.func @transform_6(%arg0: i32) -> (i32, i32, i32) {
    %c0_i32 = arith.constant 0 : i32
    %c0_i32_0 = arith.constant 0 : i32
    %c0_i32_1 = arith.constant 0 : i32
    return %arg0, %c0_i32, %c0_i32_0 : i32, i32, i32
  }
  func.func @transform_7(%arg0: i32) -> (i32, i32, i32) {
    %c0_i32 = arith.constant 0 : i32
    %c0_i32_0 = arith.constant 0 : i32
    %c0_i32_1 = arith.constant 0 : i32
    return %arg0, %c0_i32, %c0_i32_0 : i32, i32, i32
  }
  func.func @transform_8(%arg0: i32) -> (i32, i32, i32) {
    %c0_i32 = arith.constant 0 : i32
    %c0_i32_0 = arith.constant 0 : i32
    %c0_i32_1 = arith.constant 0 : i32
    return %arg0, %c0_i32, %c0_i32_0 : i32, i32, i32
  }
  func.func @transform_9(%arg0: i32) -> (i32, i32, i32) {
    %c0_i32 = arith.constant 0 : i32
    %c0_i32_0 = arith.constant 0 : i32
    %c0_i32_1 = arith.constant 0 : i32
    return %arg0, %c0_i32, %c0_i32_0 : i32, i32, i32
  }
  func.func @transform_10(%arg0: i32) -> i32 {
    %c0_i32 = arith.constant 0 : i32
    %c0_i32_0 = arith.constant 0 : i32
    return %c0_i32 : i32
  }
  func.func @transform_11(%arg0: i32) -> (i32, i32, i32) {
    %c0_i32 = arith.constant 0 : i32
    %c0_i32_0 = arith.constant 0 : i32
    %c0_i32_1 = arith.constant 0 : i32
    return %arg0, %c0_i32, %c0_i32_0 : i32, i32, i32
  }
}

</mosaic_0001>

<bundles_post_ra>
// kernel: tpu_custom_call.1
= control target key start
LH: loop header
LB: loop body
LE: loop exit
PB: predicated region body
PF: predicated region fallthrough
CT: control target
= control target key end

     0   :  { %s1841_s0 = inlined_call_operand.vmem [shape: bf16[2,2,8,32], index: 0, kind: input, shape index: {}]   ;;  %s1842_s1 = inlined_call_operand.vmem [shape: bf16[2,32,32], index: 1, kind: input, shape index: {}]   ;;  %s1843_s2 = inlined_call_operand.vmem [shape: f32[2,1,32], index: 2, kind: input, shape index: {}]   ;;  %s1844_s3 = inlined_call_operand.vmem [shape: f32[2,1,32], index: 3, kind: input, shape index: {}]   ;;  %s1845_s4 = inlined_call_operand.vmem [shape: f32[2,1,32], index: 4, kind: input, shape index: {}]   ;;  %s1846_s5 = inlined_call_operand.vmem [shape: bf16[2,288,32], index: 5, kind: input, shape index: {}]   ;;  %s1847_s6 = inlined_call_operand.vmem [shape: f32[2,1,32], index: 6, kind: input, shape index: {}]   ;;  %s1848_s7 = inlined_call_operand.vmem [shape: f32[2,1,32], index: 7, kind: input, shape index: {}]   ;;  %s1849_s8 = inlined_call_operand.vmem [shape: f32[2,1,32], index: 8, kind: input, shape index: {}]   ;;  %s1850_s9 = inlined_call_operand.vmem [shape: f32[2,1,32], index: 9, kind: input, shape index: {}]   ;;  %s1851_s10 = inlined_call_operand.vmem [shape: f32[2], index: 10, kind: input, shape index: {}]   ;;  %s1852_s11 = inlined_call_operand.hbm [shape: f32[2,2,8], index: 11, kind: output, shape index: {}]  }
   0x1   :  { %1854 = sst [smem:[#allocation10_spill]] %s1851_s10 }
   0x2   :  { %16 = vsyncpa [#allocation4], 0 }
   0x3   :  { %17 = vsyncpa [#allocation3], 0 }
   0x4   :  { %19 = vsyncpa [#allocation3 + $0x1], 0  ;;  %s1626_s17 = smov 0   ;;  %s1628_s18 = smov 0  }
   0x5   :  { %s1630_s19 = smov 0   ;;  %s1632_s20 = smov 0  }
   0x6 LB: > { %1855 = sst [smem:[#allocation8_spill]] %s1553_s19  ;;  %s1647_s21 = sadd.s32 4294967295, %s1557_s20   ;;  %s1557_s20 = sphi %s1632_s20, %s1865_s20   ;;  %s1553_s19 = sphi %s1630_s19, %s1862_s19   ;;  %s1549_s18 = sphi %s1628_s18, %s1864_s18   ;;  %s1545_s17 = sphi %s1626_s17, %s1863_s17  }
   0x7   : > { %s1269_s22 = sadd.s32 4294967294, %s1557_s20   ;;  %s1651_s23 = sadd.s32 1, %s1557_s20  }
   0x8   : > { %s313_s24 = sadd.s32 1, %s1553_s19  ;;  %s310_s25 = ssub.s32 %s1557_s20, %s1651_s23 }
   0x9   : > { %p323_p0 = scmp.ne.s32.totalorder %s1553_s19, %s1549_s18  ;;  %p311_p1 = scmp.eq.s32.totalorder %s310_s25, 0 }
   0xa   : > { %p324_p2 = scmp.eq.s32.totalorder %s1647_s21, 1  ;;  %p329_p3 = scmp.ne.s32.totalorder %s1549_s18, %s1545_s17 }
   0xb   : > { %p330_p4 = scmp.eq.s32.totalorder %s1269_s22, 1  ;;  %p1270_p7 = scmp.ge.s32.totalorder %s1557_s20, 1 }
   0xc   : > { %s1662_s26 = scalar_select %p311_p1, %s1553_s19, %s313_s24  }
   0xd   : > { %p1664_p5 = por %p324_p2, %p323_p0  ;;  %p1668_p6 = por %p330_p4, %p329_p3 }
   0xe   : > { %1856 = sst [smem:[#allocation9_spill]] %s1662_s26  ;;  %p337_p8 = scmp.lt.s32.totalorder %s1557_s20, 3 }
   0xf   : > { %p1382_p9 = scmp.eq.s32.totalorder %s1647_s21, 0  ;;  %s1860_s10 = sld [smem:[#allocation10_spill]] }
  0x10   : > { %p1675_p10 = pnand %p1270_p7, %p337_p8 }
  0x12   : > { %p1374_p11 = pneg %p1675_p10 }
  0x14   : > { %p1375_p12 = pnand %p1382_p9, %p1374_p11 }
  0x15   : > { %s350_s13 = sshll.u32 %s1860_s10, 4  ;;  %s351_s13 = int_to_ptr.vmem [resolvable:$true] %s350_s13 }
  0x16   : > { %s1478_s14 = scalar_lea.vmem %s351_s13, 16  ;;  %p1480_p0 = pneg %p1375_p12 }
  0x17   : > { %p1479_p13 = scmp.ne.s32.totalorder %s351_s13, %s1478_s14  ;;  %p1486_p3 = scmp.lt.s32.totalorder %s351_s13, %s351_s13 }
  0x18   : > { %p1487_p4 = scmp.lt.s32.totalorder %s1478_s14, %s1478_s14 }
  0x19   : > { %p1481_p1 = pnand %p1480_p0, %p1479_p13 }
  0x1a   : > { %p1488_p7 = por %p1487_p4, %p1486_p3 }
  0x1b   : > { %p1482_p2 = pneg %p1481_p1 }
  0x1d   : > { %p1489_p8 = pnand %p1488_p7, %p1482_p2 }
  0x1f   : > { %1492 = shalt.err (!%p1489_p8)
}
  0x20   : > { %s1559_s15 = smov [#allocation2]   ;;  %429 = sbr.rel (%p1675_p10) target bundleno = 880 (0x370), region = 64 }
  0x21   : > { %1377 = dma.vmem_to_smem (!%p1375_p12), %s351_s13, 16, %s1559_s15, [#allocation4]  }
  0x25   : > { %1536 = dma.done.wait (%p1382_p9), [#allocation4], 16  }
  0x26   : > { %1538 = vsyncadd (%p1382_p9), [#allocation4], 4294967280 }
  0x27   : > { %435 = sfence }
  0x28   : > { %p501_p11 = scmp.lt.s32.totalorder %s1647_s21, 1  ;;  %v1560_v0 = vmov 0.0   ;;  %vm1561_vm0 = vmmov 0   ;;  %vm561_vm1 = vcmask 261120   ;;  %s1562_s14 = smov 64   ;;  %vm732_vm4 = vcmask 523264  }
  0x29   : > { %1351 = vmatprep.subr.bf16.mxu0 %v1560_v0  ;;  %1355 = vmatprep.mubr.msk.bf16.mxu0 %vm1561_vm0, %v1560_v0  ;;  %vm735_vm5 = vcmask 785408   ;;  %s498_s10 = sand.u32 1, %s1549_s18   ;;  %vm1092_vm8 = vcmask 1041409   ;;  %vm1095_vm9 = vcmask 58368  }
  0x2a   : > { %s1695_s16 = scalar_select %p501_p11, %s1647_s21, 1 }
  0x2b   : > { %s1275_s26 = sshll.u32 %s498_s10, 1 }
  0x2c   : > { %s1319_s22 = sshll.u32 %s1695_s16, 4  ;;  %s1367_s24 = smul.u32 144, %s1695_s16 }
  0x2d   : > { %s510_s30 = scalar_lea.vmem %s1842_s1, %s1319_s22  ;;  %s1318_s12 = sshll.u32 %s1695_s16, 3 }
  0x2e   : > { %v1453_v1 = vld [vmem:[%s510_s30 + $0x8] sm:$0xff]   ;;  %s505_s15 = scalar_lea.vmem %s1841_s0, %s1318_s12  ;;  %s1709_s19 = scalar_lea.vmem %s1846_s5, %s1367_s24  ;;  %v1454_v2 = vld [vmem:[%s510_s30] sm:$0xff]  }
  0x2f   : > { %1352 = vmatpush3.bf16.msra.mxu0 %v1453_v1  ;;  %v1455_v3 = vld [vmem:[%s505_s15] sm:$0xff]   ;;  %v1456_v4 = vld [vmem:[%s1709_s19 + $0x88] sm:$0xff]   ;;  %v1458_v6 = vld [vmem:[%s1709_s19 + $0x78] sm:$0xff]   ;;  %s513_s22 = scalar_lea.vmem %s1843_s2, %s1695_s16  ;;  %s516_s29 = scalar_lea.vmem %s1844_s3, %s1695_s16 }
  0x30   : > { %1353 = vmatprep.subr.bf16.mxu0 %v1560_v0  ;;  %v1457_v5 = vld [vmem:[%s1709_s19 + $0x80] sm:$0xff]   ;;  %v1459_v7 = vld [vmem:[%s1709_s19 + $0x38] sm:$0xff]   ;;  %v1460_v8 = vld [vmem:[%s1709_s19 + $0x70] sm:$0xff]   ;;  %1326 = vmatprep.subr.bf16.mxu1 %v1458_v6  ;;  %s519_s13 = scalar_lea.vmem %s1845_s4, %s1695_s16  ;;  %s1563_s15 = smov 32  }
  0x31   : > { %1327 = vmatpush3.bf16.msra.mxu1 %v1459_v7  ;;  %v1461_v9 = vld [vmem:[%s1709_s19 + $0x30] sm:$0xff]   ;;  %v1462_v10 = vld [vmem:[%s1709_s19 + $0x68] sm:$0xff]   ;;  %v1464_v12 = vld [vmem:[%s1709_s19 + $0x60] sm:$0xff]   ;;  %s500_s24 = scalar_lea.vmem [#allocation5], %s1275_s26 }
  0x32   : > { %1328 = vmatprep.subr.bf16.mxu1 %v1460_v8  ;;  %v1463_v11 = vld [vmem:[%s1709_s19 + $0x28] sm:$0xff]   ;;  %v1465_v13 = vld [vmem:[%s1709_s19 + $0x20] sm:$0xff]   ;;  %v1466_v14 = vld [vmem:[%s1709_s19 + $0x58] sm:$0xff]   ;;  %s1111_s25 = sshll.u32 %s500_s24, 4  ;;  %s1112_s25 = int_to_ptr.vmem [resolvable:$true] %s1111_s25 }
  0x33   : > { %1354 = vmatpush3.bf16.msra.mxu0 %v1454_v2  ;;  %v1467_v15 = vld [vmem:[%s1709_s19 + $0x18] sm:$0xff]   ;;  %v1285_v17 = vld [vmem:[%s513_s22] ss:$0 sm:$0xff]  ;;  %v1468_v52 = vld [vmem:[%s1709_s19 + $0x50] sm:$0xff]   ;;  %s527_s22 = scalar_lea.vmem %s1847_s6, %s1695_s16 }
  0x34   : > { %1359 = vmatprep.subr.bf16.mxu0 %v1560_v0  ;;  %v1286_v49 = vld [vmem:[%s516_s29] ss:$0 sm:$0xff]  ;;  %v1469_v53 = vld [vmem:[%s1709_s19 + $0x10] sm:$0xff]   ;;  %v1470_v61 = vld [vmem:[%s1709_s19 + $0x48] sm:$0xff]   ;;  %s530_s29 = scalar_lea.vmem %s1848_s7, %s1695_s16 }
  0x35   : > { %1329 = vmatpush3.bf16.msra.mxu1 %v1461_v9  ;;  %v1287_v54 = vld [vmem:[%s519_s13] ss:$0 sm:$0xff]  ;;  %v1471_v62 = vld [vmem:[%s1709_s19 + $0x8] sm:$0xff]   ;;  %s533_s13 = scalar_lea.vmem %s1849_s8, %s1695_s16 }
  0x36   : > { %1356 = vmatmul.mubr.msk.bf16.vlgmr.msra.gmra.mxu0 %vm561_vm1, %v1455_v3  ;;  %1330 = vmatprep.subr.bf16.mxu1 %v1462_v10  ;;  %v1472_v1 = vld [vmem:[%s1709_s19 + $0x40] sm:$0xff]  }
  0x37   : > { %1363 = vmatprep.mubr.msk.bf16.mxu0 %vm1561_vm0, %v1560_v0  ;;  %1360 = vmatpush3.bf16.msra.mxu0 %v1456_v4  ;;  %v1473_v10 = vld [vmem:[%s1709_s19] sm:$0xff]   ;;  %s1564_s19 = smov 96  }
  0x38   : > { %1361 = vmatprep.subr.bf16.mxu0 %v1560_v0 }
  0x39   : > { %1331 = vmatpush3.bf16.msra.mxu1 %v1463_v11 }
  0x3a   : > { %1332 = vmatprep.subr.bf16.mxu1 %v1464_v12 }
  0x3b   : > { %1362 = vmatpush3.bf16.msra.mxu0 %v1457_v5 }
  0x3d   : > { %1333 = vmatpush3.bf16.msra.mxu1 %v1465_v13 }
  0x3e   : > { %1334 = vmatprep.subr.bf16.mxu1 %v1466_v14 }
  0x41   : > { %1335 = vmatpush3.bf16.msra.mxu1 %v1467_v15 }
  0x42   : > { %1336 = vmatprep.subr.bf16.mxu1 %v1468_v52 }
  0x45   : > { %1337 = vmatpush3.bf16.msra.mxu1 %v1469_v53 }
  0x46   : > { %1338 = vmatprep.subr.bf16.mxu1 %v1470_v61 }
  0x49   : > { %1339 = vmatpush3.bf16.msra.mxu1 %v1471_v62 }
  0x4a   : > { %1340 = vmatprep.subr.bf16.mxu1 %v1472_v1 }
  0x4d   : > { %1341 = vmatpush3.bf16.msra.mxu1 %v1473_v10 }
  0xf6   : > { %v599_v16 = vpop.f32.mrf.mxu0 }
  0xf7   : > { %v613_v19 = vadd.f32 %v1285_v17, %v599_v16 }
  0xf8   : > { %v1357_v18 = vpop.f32.mrf.mxu0 }
  0xf9   : > { %v617_v23 = vsel %vm561_vm1, %v613_v19, 0.0 }
  0xfa   : > { %v602_v20 = vpop.f32.mrf.mxu0 }
  0xfb   : > { %v614_v21 = vadd.f32 %v1285_v17, %v602_v20 }
  0xfc   : > { %v1358_v22 = vpop.f32.mrf.mxu0 }
  0xfd   : > { %v618_v24 = vsel %vm561_vm1, %v614_v21, 0.0 }
  0xfe   : > { %v619_v25 = vadd.f32 %v618_v24, %v617_v23 }
 0x100   : > { %v620_v26 = vrot.slane %v619_v25, 4 }
 0x102   : > { %v621_v27 = vadd.f32 %v620_v26, %v619_v25 }
 0x104   : > { %v622_v28 = vrot.slane %v621_v27, 2 }
 0x106   : > { %v623_v29 = vadd.f32 %v622_v28, %v621_v27 }
 0x108   : > { %v624_v30 = vrot.slane %v623_v29, 1 }
 0x10a   : > { %v625_v31 = vadd.f32 %v624_v30, %v623_v29 }
 0x10c   : > { %v627_v32 = vmul.f32 0.0625, %v625_v31 }
 0x10e   : > { %v628_v33 = vsub.f32 %v613_v19, %v627_v32  ;;  %v629_v34 = vsub.f32 %v614_v21, %v627_v32 }
 0x110   : > { %v630_v35 = vmul.f32 %v628_v33, %v628_v33  ;;  %v631_v36 = vmul.f32 %v629_v34, %v629_v34 }
 0x112   : > { %v632_v37 = vsel %vm561_vm1, %v630_v35, 0.0  ;;  %v633_v38 = vsel %vm561_vm1, %v631_v36, 0.0 }
 0x113   : > { %v634_v39 = vadd.f32 %v633_v38, %v632_v37 }
 0x115   : > { %v635_v40 = vrot.slane %v634_v39, 4 }
 0x117   : > { %v636_v41 = vadd.f32 %v635_v40, %v634_v39 }
 0x119   : > { %v637_v42 = vrot.slane %v636_v41, 2 }
 0x11b   : > { %v638_v43 = vadd.f32 %v637_v42, %v636_v41 }
 0x11d   : > { %v639_v44 = vrot.slane %v638_v43, 1 }
 0x11f   : > { %v640_v45 = vadd.f32 %v639_v44, %v638_v43 }
 0x121   : > { %v641_v46 = vmul.f32 0.0625, %v640_v45 }
 0x123   : > { %v642_v47 = vadd.f32 1e-05, %v641_v46 }
 0x125   : > { %1474 = vrsqrt.f32 %v642_v47 }
 0x132   : > { %v1475_v48 = vpop.eup %1474 }
 0x133   : > { %v644_v50 = vmul.f32 %v1475_v48, %v628_v33  ;;  %v645_v51 = vmul.f32 %v1475_v48, %v629_v34 }
 0x135   : > { %v652_v55 = vmul.f32 %v1286_v49, %v644_v50  ;;  %v653_v56 = vmul.f32 %v1286_v49, %v645_v51 }
 0x137   : > { %v660_v57 = vadd.f32 %v1287_v54, %v652_v55  ;;  %v661_v58 = vadd.f32 %v1287_v54, %v653_v56 }
 0x139   : > { %vm662_vm2 = vcmp.gt.f32.partialorder %v660_v57, 0.0  ;;  %vm663_vm3 = vcmp.gt.f32.partialorder %v661_v58, 0.0  ;;  %v664_v59 = vmul.f32 0.2, %v660_v57  ;;  %v665_v60 = vmul.f32 0.2, %v661_v58 }
 0x13b   : > { %v1745_v63 = vsel %vm662_vm2, %v660_v57, %v664_v59  ;;  %v1747_v0 = vsel %vm663_vm3, %v661_v58, %v665_v60 }
 0x13c   : > { %v678_v2 = vrot.slane %v1745_v63, 2  ;;  %v679_v3 = vrot.slane %v1747_v0, 2  ;;  %v676_v4 = vrot.slane %v1745_v63, 1  ;;  %v677_v5 = vrot.slane %v1747_v0, 1 }
 0x13d   : > { %v668_v6 = vrot.slane %v1745_v63, 4  ;;  %v669_v7 = vrot.slane %v1747_v0, 4  ;;  %v672_v8 = vrot.slane %v1745_v63, 6  ;;  %v673_v9 = vrot.slane %v1747_v0, 6 }
 0x13e   : > { %v1433_v11 = vpack.i.bf16 %v679_v3, %v678_v2  ;;  %v1423_v12 = vpack.i.bf16 %v677_v5, %v676_v4  ;;  %v670_v13 = vrot.slane %v1745_v63, 5  ;;  %v671_v14 = vrot.slane %v1747_v0, 5  ;;  %v1310_v3 = vld [vmem:[%s527_s22] ss:$0 sm:$0xff]  ;;  %s1315_s22 = sshll.u32 %s1647_s21, 5 }
 0x13f   : > { %v1322_v15 = vpack.c.bf16 %v669_v7, %v668_v6  ;;  %v1438_v16 = vpack.i.bf16 %v673_v9, %v672_v8  ;;  %v674_v17 = vrot.slane %v1745_v63, 7  ;;  %v675_v19 = vrot.slane %v1747_v0, 7  ;;  %s1806_s12 = scalar_lea.hbm %s1852_s11, %s1315_s22 }
 0x140   : > { %1434 = vrot.lane.b32.xlu1 %v1433_v11, %s1562_s14  ;;  %1424 = vrot.lane.b32.xlu0 %v1423_v12, %s1563_s15  ;;  %v1428_v18 = vpack.i.bf16 %v671_v14, %v670_v13  ;;  %v680_v20 = vrot.slane %v1745_v63, 3  ;;  %v681_v21 = vrot.slane %v1747_v0, 3 }
 0x141   : > { %1364 = vmatmul.mubr.msk.bf16.vlgmr.msra.gmra.mxu0 %vm561_vm1, %v1322_v15  ;;  %v1448_v22 = vpack.i.bf16 %v675_v19, %v674_v17 }
 0x142   : > { %v1443_v23 = vpack.i.bf16 %v681_v21, %v680_v20 }
 0x144   : > { %1439 = vrot.lane.b32.xlu1 %v1438_v16, %s1562_s14  ;;  %1429 = vrot.lane.b32.xlu0 %v1428_v18, %s1563_s15  ;;  %s1493_s14 = scalar_lea.vmem %s1112_s25, 32 }
 0x145   : > { %p1494_p9 = scmp.ne.s32.totalorder %s1112_s25, %s1493_s14 }
 0x147   : > { %p1495_p10 = pnand %p1494_p9, %p1664_p5 }
 0x148   : > { %1449 = vrot.lane.b32.xlu1 %v1448_v22, %s1564_s19  ;;  %1444 = vrot.lane.b32.xlu0 %v1443_v23, %s1564_s19  ;;  %s536_s19 = scalar_lea.vmem %s1850_s9, %s1695_s16  ;;  %s1076_s16 = sld [smem:[#allocation2 + %s1647_s21]] }
 0x149   : > { %p1496_p12 = pneg %p1495_p10  ;;  %s1565_s21 = smov [#allocation5]  }
 0x14a   : > { %s1497_s15 = sshll.u32 %s1565_s21, 4  ;;  %s1498_s15 = int_to_ptr.vmem [resolvable:$false] %s1497_s15 }
 0x14b   : > { %p1500_p13 = scmp.lt.s32.totalorder %s1112_s25, %s1498_s15 }
 0x1b2   : > { %v1435_v24 = vpop.permute.xlu1 %1434  ;;  %v1425_v25 = vpop.permute.xlu0 %1424 }
 0x1b3   : > { %v1427_v26 = vunpack.i.h.bf16 %v1425_v25  ;;  %v1426_v27 = vunpack.i.l.bf16 %v1425_v25  ;;  %v1437_v32 = vunpack.i.h.bf16 %v1435_v24  ;;  %v1436_v33 = vunpack.i.l.bf16 %v1435_v24 }
 0x1b5   : > { %v738_v38 = vsel %vm561_vm1, %v1745_v63, %v1426_v27  ;;  %v739_v39 = vsel %vm561_vm1, %v1747_v0, %v1427_v26 }
 0x1b6   : > { %v1440_v28 = vpop.permute.xlu1 %1439  ;;  %v1430_v29 = vpop.permute.xlu0 %1429  ;;  %v740_v46 = vsel %vm732_vm4, %v738_v38, %v1436_v33  ;;  %v741_v47 = vsel %vm732_vm4, %v739_v39, %v1437_v32  ;;  %v1312_v38 = vld [vmem:[%s533_s13] ss:$0 sm:$0xff]  ;;  %s1098_s13 = scalar_lea.sflag [#allocation3], %s498_s10 }
 0x1b7   : > { %v1432_v30 = vunpack.i.h.bf16 %v1430_v29  ;;  %v1431_v31 = vunpack.i.l.bf16 %v1430_v29  ;;  %v1442_v34 = vunpack.i.h.bf16 %v1440_v28  ;;  %v1441_v35 = vunpack.i.l.bf16 %v1440_v28 }
 0x1b9   : > { %v731_v36 = vsel %vm561_vm1, %v669_v7, %v1432_v30  ;;  %v730_v37 = vsel %vm561_vm1, %v668_v6, %v1431_v31 }
 0x1ba   : > { %v1450_v40 = vpop.permute.xlu1 %1449  ;;  %v1445_v41 = vpop.permute.xlu0 %1444  ;;  %v733_v48 = vsel %vm732_vm4, %v730_v37, %v1441_v35  ;;  %v734_v49 = vsel %vm732_vm4, %v731_v36, %v1442_v34  ;;  %v1311_v35 = vld [vmem:[%s530_s29] ss:$0 sm:$0xff] }
 0x1bb   : > { %v1452_v42 = vunpack.i.h.bf16 %v1450_v40  ;;  %v1451_v43 = vunpack.i.l.bf16 %v1450_v40  ;;  %v1447_v44 = vunpack.i.h.bf16 %v1445_v41  ;;  %v1446_v45 = vunpack.i.l.bf16 %v1445_v41 }
 0x1bd   : > { %v742_v50 = vsel %vm735_vm5, %v740_v46, %v1446_v45  ;;  %v743_v51 = vsel %vm735_vm5, %v741_v47, %v1447_v44  ;;  %v736_v52 = vsel %vm735_vm5, %v733_v48, %v1451_v43  ;;  %v737_v53 = vsel %vm735_vm5, %v734_v49, %v1452_v42  ;;  %v1313_v49 = vld [vmem:[%s536_s19] ss:$0 sm:$0xff]  ;;  %s1499_s19 = scalar_lea.vmem %s1498_s15, 64 }
 0x1be   : > { %v1321_v54 = vpack.c.bf16 %v743_v51, %v742_v50  ;;  %v1320_v55 = vpack.c.bf16 %v737_v53, %v736_v52  ;;  %p1501_p0 = scmp.lt.s32.totalorder %s1499_s19, %s1493_s14 }
 0x1c0   : > { %946 = vmatprep.mubr.bf16.mxu1 %v1321_v54  ;;  %p1502_p1 = por %p1501_p0, %p1500_p13 }
 0x1c1   : > { %947 = vmatmul.mubr.bf16.vlgmr.msra.gmra.mxu1 %v1320_v55 }
 0x1c2   : > { %p1503_p2 = pnand %p1502_p1, %p1496_p12 }
 0x201   : > { %v989_v56 = vpop.f32.mrf.mxu0 }
 0x203   : > { %v1365_v57 = vpop.f32.mrf.mxu0 }
 0x205   : > { %v992_v58 = vpop.f32.mrf.mxu0 }
 0x207   : > { %v1366_v59 = vpop.f32.mrf.mxu0 }
 0x281   : > { %v1342_v60 = vpop.f32.mrf.mxu1 }
 0x283   : > { %v1343_v61 = vpop.f32.mrf.mxu1 }
 0x284   : > { %v1344_v62 = vadd.f32 %v1343_v61, %v1342_v60 }
 0x285   : > { %v1345_v1 = vpop.f32.mrf.mxu1 }
 0x286   : > { %v990_v2 = vadd.f32 %v1344_v62, %v989_v56  ;;  %v1082_v56 = vlaneseq }
 0x287   : > { %v1346_v4 = vpop.f32.mrf.mxu1 }
 0x288   : > { %v1347_v5 = vadd.f32 %v1346_v4, %v1345_v1  ;;  %v1003_v6 = vadd.f32 %v1310_v3, %v990_v2  ;;  %v1083_v57 = vand.u32 127, %v1082_v56 }
 0x28a   : > { %v993_v7 = vadd.f32 %v1347_v5, %v992_v58  ;;  %v1007_v9 = vsel %vm561_vm1, %v1003_v6, 0.0  ;;  %v1085_v58 = vshrl.u32 %v1082_v56, 7 }
 0x28c   : > { %v1004_v8 = vadd.f32 %v1310_v3, %v993_v7 }
 0x28e   : > { %v1008_v10 = vsel %vm561_vm1, %v1004_v8, 0.0 }
 0x28f   : > { %v1009_v11 = vadd.f32 %v1008_v10, %v1007_v9 }
 0x291   : > { %v1010_v12 = vrot.slane %v1009_v11, 4 }
 0x293   : > { %v1011_v13 = vadd.f32 %v1010_v12, %v1009_v11 }
 0x295   : > { %v1012_v14 = vrot.slane %v1011_v13, 2 }
 0x297   : > { %v1013_v15 = vadd.f32 %v1012_v14, %v1011_v13 }
 0x299   : > { %v1014_v16 = vrot.slane %v1013_v15, 1 }
 0x29b   : > { %v1015_v17 = vadd.f32 %v1014_v16, %v1013_v15 }
 0x29d   : > { %v1016_v18 = vmul.f32 0.0625, %v1015_v17 }
 0x29f   : > { %v1017_v19 = vsub.f32 %v1003_v6, %v1016_v18  ;;  %v1018_v20 = vsub.f32 %v1004_v8, %v1016_v18 }
 0x2a1   : > { %v1019_v21 = vmul.f32 %v1017_v19, %v1017_v19  ;;  %v1020_v22 = vmul.f32 %v1018_v20, %v1018_v20 }
 0x2a3   : > { %v1021_v23 = vsel %vm561_vm1, %v1019_v21, 0.0  ;;  %v1022_v24 = vsel %vm561_vm1, %v1020_v22, 0.0 }
 0x2a4   : > { %v1023_v25 = vadd.f32 %v1022_v24, %v1021_v23 }
 0x2a6   : > { %v1024_v26 = vrot.slane %v1023_v25, 4 }
 0x2a8   : > { %v1025_v27 = vadd.f32 %v1024_v26, %v1023_v25 }
 0x2aa   : > { %v1026_v28 = vrot.slane %v1025_v27, 2 }
 0x2ac   : > { %v1027_v29 = vadd.f32 %v1026_v28, %v1025_v27 }
 0x2ae   : > { %v1028_v30 = vrot.slane %v1027_v29, 1 }
 0x2b0   : > { %v1029_v31 = vadd.f32 %v1028_v30, %v1027_v29 }
 0x2b2   : > { %v1030_v32 = vmul.f32 0.0625, %v1029_v31 }
 0x2b4   : > { %v1031_v33 = vadd.f32 1e-05, %v1030_v32 }
 0x2b6   : > { %1476 = vrsqrt.f32 %v1031_v33 }
 0x2c3   : > { %v1477_v34 = vpop.eup %1476 }
 0x2c4   : > { %v1033_v36 = vmul.f32 %v1477_v34, %v1017_v19  ;;  %v1034_v37 = vmul.f32 %v1477_v34, %v1018_v20 }
 0x2c6   : > { %v1042_v39 = vmul.f32 %v1311_v35, %v1034_v37  ;;  %v1041_v40 = vmul.f32 %v1311_v35, %v1033_v36 }
 0x2c8   : > { %v1050_v41 = vadd.f32 %v1312_v38, %v1042_v39  ;;  %v1049_v42 = vadd.f32 %v1312_v38, %v1041_v40 }
 0x2ca   : > { %vm1052_vm6 = vcmp.gt.f32.partialorder %v1050_v41, 0.0  ;;  %v1054_v43 = vmul.f32 0.2, %v1050_v41  ;;  %vm1051_vm7 = vcmp.gt.f32.partialorder %v1049_v42, 0.0  ;;  %v1053_v44 = vmul.f32 0.2, %v1049_v42 }
 0x2cc   : > { %v1056_v45 = vsel %vm1052_vm6, %v1050_v41, %v1054_v43  ;;  %v1055_v46 = vsel %vm1051_vm7, %v1049_v42, %v1053_v44 }
 0x2cd   : > { %v1058_v47 = vadd.f32 %v1056_v45, %v1747_v0  ;;  %v1057_v48 = vadd.f32 %v1055_v46, %v1745_v63  ;;  %v1077_v0 = vstv %s1076_s16  ;;  %v1086_v63 = vsub.s32 %v1083_v57, %v1085_v58 }
 0x2cf   : > { %v1060_v50 = vmul.f32 0.70710677, %v1058_v47  ;;  %v1059_v51 = vmul.f32 0.70710677, %v1057_v48 }
 0x2d1   : > { %v1069_v52 = vmul.f32 %v1313_v49, %v1060_v50  ;;  %v1068_v53 = vmul.f32 %v1313_v49, %v1059_v51 }
 0x2d3   : > { %v1073_v54 = vsel %vm561_vm1, %v1069_v52, 0.0  ;;  %v1070_v55 = vsel %vm561_vm1, %v1068_v53, 0.0 }
 0x2d4   : > { %1074 = vadd.xlane.f32.xlu1 %v1073_v54  ;;  %1071 = vadd.xlane.f32.xlu0 %v1070_v55 }
 0x35d   : > { %v1075_v59 = vpop.xlane.xlu1 %1074  ;;  %v1072_v60 = vpop.xlane.xlu0 %1071 }
 0x35e   : > { %v1079_v61 = vadd.f32 %v1077_v0, %v1075_v59  ;;  %v1078_v62 = vadd.f32 %v1077_v0, %v1072_v60 }
 0x360   : > { %v1091_v1 = vrot.slane %v1079_v61, %v1086_v63  ;;  %v1087_v2 = vrot.slane %v1078_v62, %v1086_v63 }
 0x362   : > { %v1093_v3 = vsel %vm1092_vm8, %v1091_v1, %v1087_v2 }
 0x363   : > { %1096 = vst.msk [vmem:[%s500_s24] sm:$0x3] %vm1095_vm9, %v1093_v3 }
 0x364   : > { %1506 = shalt.err (!%p1503_p2)
}
 0x365   : > { %s1507_s16 = scalar_lea.hbm %s1806_s12, 32  ;;  %s1511_s22 = scalar_lea.hbm %s1852_s11, 64 }
 0x366   : > { %p1508_p3 = scmp.ne.s32.totalorder %s1806_s12, %s1507_s16  ;;  %p1512_p8 = scmp.lt.s32.totalorder %s1806_s12, %s1852_s11 }
 0x367   : > { %p1513_p11 = scmp.lt.s32.totalorder %s1511_s22, %s1507_s16 }
 0x368   : > { %p1509_p4 = pnand %p1508_p3, %p1664_p5 }
 0x369   : > { %p1514_p9 = por %p1513_p11, %p1512_p8 }
 0x36a   : > { %p1510_p7 = pneg %p1509_p4 }
 0x36c   : > { %p1515_p10 = pnand %p1514_p9, %p1510_p7 }
 0x36e   : > { %1518 = shalt.err (!%p1515_p10)
}
 0x36f   : > { %1372 = dma.vmem_to_hbm [thread:$0]  (%p1664_p5), %s1112_s25, 32, %s1806_s12, %s1098_s13  }
 0x370 PF: > { %p1384_p12 = scmp.ge.s32.totalorder %s1557_s20, 2  ;;  %s1123_s30 = sand.u32 1, %s1545_s17  }
 0x371   : > { %s1124_s14 = scalar_lea.sflag [#allocation3], %s1123_s30 }
 0x372   : > { %p1379_p13 = pnand %p1384_p12, %p1668_p6 }
 0x374   : > { %p1380_p0 = pneg %p1379_p13 }
 0x376   : > { %1540 = dma.done.wait (%p1380_p0), %s1124_s14, 32  }
 0x377   : > { %1542 = vsyncadd (%p1380_p0), %s1124_s14, 4294967264  ;;  %s1861_s21 = sld [smem:[#allocation8_spill]]  ;;  %p22_p1 = scmp.ge.s32.totalorder %s1651_s23, 4  }
 0x378   : > { %s1862_s19 = sld [smem:[#allocation9_spill]]  ;;  %s1863_s17 = smov %s1549_s18 }
 0x379   : > { %s1865_s20 = smov %s1651_s23  ;;  %24 = sbr.rel (!%p22_p1) target bundleno = 6 (0x6), region = 131 }
 0x37d   : > { %s1864_s18 = smov %s1861_s21 }
 0x37e   :  { %1129 = vsyncpa [#allocation3], 1 }
 0x37f   :  { %1131 = vsyncpa [#allocation3 + $0x1], 1 }
 0x380   :  { %1132 = vsyncpa [#allocation4], 1 }
 0x381   :  { %1134 = vsyncpa [#allocation4 + $0x1], 1 }

</bundles_post_ra>
